<compile_context>
chip_gen: v6e
topology: v6e:2x2x1
jax: 0.10.0
libtpu: 0.0.40
codegen_flags: <defaults>
</compile_context>

<pallas_src>
import functools

import jax
import jax.numpy as jnp
from jax import lax
from jax.experimental import pallas as pl
from jax.experimental.pallas import tpu as pltpu


def _round_up(x, m):
    return (x + m - 1) // m * m


def _ms_kernel(x_ref, w_ref, b_ref, o_ref, patches_ref, *, wp4):
    """One batch element.

    x_ref:       (1, Cin, in_w)  zero-padded, row-flattened padded image (lane-dense)
    w_ref:       (Cout, 25*Cin)  folded 5x5 weight, column index = (dy*5+dx)*Cin + c
    b_ref:       (Cout, 1)       folded bias
    o_ref:       (1, Cout, S)    output slab indexed by padded-frame flat position
    patches_ref: (25*Cin, S)     im2col scratch (VMEM)
    """
    cin = x_ref.shape[1]
    s_len = o_ref.shape[2]
    xf = x_ref[0]                                   # (Cin, in_w)

    # Build the 25-tap im2col once: tap (dy, dx) is a static lane-offset slice.
    for dy in range(5):
        for dx in range(5):
            t = dy * 5 + dx
            shift = dy * wp4 + dx
            patches_ref[t * cin:(t + 1) * cin, :] = xf[:, shift:shift + s_len]

    # Single MXU matmul: (Cout, 25*Cin) @ (25*Cin, S) -> (Cout, S); f32 accumulate.
    acc = jnp.dot(w_ref[...], patches_ref[...],
                  preferred_element_type=jnp.float32)
    o_ref[0] = (acc + b_ref[...]).astype(o_ref.dtype)


def multi_scale_features(x_nchw, kernel_params):
    """Pallas implementation of MultiScaleFeatures.forward. NCHW in / NCHW out."""
    w_k, b_k = kernel_params
    n, cin, h, w = x_nchw.shape
    cout = w_k.shape[0]
    hp, wp = h + 4, w + 4
    flat = hp * wp
    s_len = _round_up(flat, 128)                   # lane-dense output slab width
    in_w = _round_up(s_len + 4 * wp + 4, 128)      # covers the largest tap shift

    # Pad by 2 spatially (enough for 1x1/3x3/5x5), flatten rows into lanes, pad the
    # lane dim to a 128 multiple.  One small fused XLA producer; no transposes.
    xp = jnp.pad(x_nchw, ((0, 0), (0, 0), (2, 2), (2, 2)))
    xf = jnp.pad(xp.reshape(n, cin, flat), ((0, 0), (0, 0), (0, in_w - flat)))

    kernel = functools.partial(_ms_kernel, wp4=wp)
    slab = pl.pallas_call(
        kernel,
        out_shape=jax.ShapeDtypeStruct((n, cout, s_len), x_nchw.dtype),
        grid=(n,),
        in_specs=[
            pl.BlockSpec((1, cin, in_w), lambda i: (i, 0, 0)),
            pl.BlockSpec(w_k.shape, lambda i: (0, 0)),   # resident across grid steps
            pl.BlockSpec(b_k.shape, lambda i: (0, 0)),
        ],
        out_specs=pl.BlockSpec((1, cout, s_len), lambda i: (i, 0, 0)),
        scratch_shapes=[pltpu.VMEM((25 * cin, s_len), x_nchw.dtype)],
        compiler_params=pltpu.CompilerParams(dimension_semantics=("parallel",)),
    )(xf, w_k, b_k)

    # TODO(synk): for large H*W*Cin add a spatial row-tile grid axis (4-row halo) and
    # an explicit vmem_limit_bytes so per-step blocks fit v7x's 64 MiB VMEM.
    # Crop the padded-frame slab back to (N, Cout, H, W).
    return slab[:, :, :flat].reshape(n, cout, hp, wp)[:, :, :h, :w]


def init_params(key, in_channels, out_channels, dtype=jnp.float32):
    """Synthetic weights in the PyTorch layouts + folded kernel-side parameters."""
    c1 = out_channels // 3
    c3 = out_channels // 3
    c5 = out_channels - 2 * (out_channels // 3)
    ks = jax.random.split(key, 8)
    w1 = 0.1 * jax.random.normal(ks[0], (c1, in_channels, 1, 1), dtype)
    b1 = 0.1 * jax.random.normal(ks[1], (c1,), dtype)
    w3 = 0.1 * jax.random.normal(ks[2], (c3, in_channels, 3, 3), dtype)
    b3 = 0.1 * jax.random.normal(ks[3], (c3,), dtype)
    w5 = 0.1 * jax.random.normal(ks[4], (c5, in_channels, 5, 5), dtype)
    b5 = 0.1 * jax.random.normal(ks[5], (c5,), dtype)
    wf = 0.1 * jax.random.normal(ks[6], (out_channels, out_channels, 1, 1), dtype)
    bf = 0.1 * jax.random.normal(ks[7], (out_channels,), dtype)
    torch_params = (w1, b1, w3, b3, w5, b5, wf, bf)

    # --- fold the 1x1 fusion into the branches: a single 5x5 conv (exact) ---
    cat_c = c1 + c3 + c5
    w_branch = jnp.zeros((cat_c, in_channels, 5, 5), dtype)
    w_branch = w_branch.at[:c1, :, 2, 2].set(w1[:, :, 0, 0])
    w_branch = w_branch.at[c1:c1 + c3, :, 1:4, 1:4].set(w3)
    w_branch = w_branch.at[c1 + c3:, :, :, :].set(w5)
    wf2 = wf[:, :, 0, 0]                                         # (Cout, cat_c)
    w_comb = jnp.einsum("om,mikl->oikl", wf2, w_branch,
                        precision=lax.Precision.HIGHEST)         # (Cout, Cin, 5, 5)
    b_cat = jnp.concatenate([b1, b3, b5])
    b_comb = jnp.einsum("om,m->o", wf2, b_cat,
                        precision=lax.Precision.HIGHEST) + bf

    # Kernel layout: (Cout, 25*Cin), column = (dy*5+dx)*Cin + c; bias (Cout, 1).
    # (Keeping f32; bf16 weights/activations would halve MXU passes on v6e/v7x but
    #  loosen the 1e-4 check.)
    w_k = jnp.transpose(w_comb, (0, 2, 3, 1)).reshape(out_channels,
                                                      25 * in_channels)
    b_k = b_comb[:, None]
    return torch_params, (w_k, b_k)


def _conv2d_ref(x, w, b, pad):
    y = lax.conv_general_dilated(
        x, w, window_strides=(1, 1), padding=[(pad, pad), (pad, pad)],
        dimension_numbers=("NCHW", "OIHW", "NCHW"),
        precision=lax.Precision.HIGHEST)
    return y + b[None, :, None, None]


def reference(x, torch_params):
    w1, b1, w3, b3, w5, b5, wf, bf = torch_params
    x1 = _conv2d_ref(x, w1, b1, 0)
    x2 = _conv2d_ref(x, w3, b3, 1)
    x3 = _conv2d_ref(x, w5, b5, 2)
    cat = jnp.concatenate([x1, x2, x3], axis=1)
    return _conv2d_ref(cat, wf, bf, 0)


if __name__ == "__main__":
    key = jax.random.PRNGKey(0)
    kx, kp = jax.random.split(key)

    N, Cin, Hs, Ws = 2, 4, 16, 16
    Cout = 6
    x = jax.random.normal(kx, (N, Cin, Hs, Ws), jnp.float32)   # NCHW, like PyTorch

    torch_params, kernel_params = init_params(kp, Cin, Cout)

    out = jax.block_until_ready(multi_scale_features(x, kernel_params))
    ref = jax.block_until_ready(reference(x, torch_params))

    assert out.shape == (N, Cout, Hs, Ws), out.shape
    max_err = float(jnp.max(jnp.abs(out - ref)))
    assert max_err < 1e-4, f"max abs err {max_err}"
    print("KERNEL_OK")
</pallas_src>

<mosaic_0001>
module attributes {stable_mosaic.version = 11 : i64} {
  func.func @_ms_kernel(%arg0: i32, %arg1: memref<1x4x640xf32, #tpu.memory_space<vmem>>, %arg2: memref<6x100xf32, #tpu.memory_space<vmem>>, %arg3: memref<6x1xf32, #tpu.memory_space<vmem>>, %arg4: memref<1x6x512xf32, #tpu.memory_space<vmem>>, %arg5: memref<100x512xf32, #tpu.memory_space<vmem>>) attributes {dimension_semantics = [#tpu.dimension_semantics<parallel>], iteration_bounds = array<i64: 2>, scalar_prefetch = 0 : i64, scratch_operands = 1 : i64, tpu.core_type = #tpu.core_type<tc>, window_params = [{transform_indices = @transform_0, window_bounds = array<i64: 1, 4, 640>}, {pipeline_mode = #tpu.pipeline_mode<synchronous>, transform_indices = @transform_1, window_bounds = array<i64: 6, 100>}, {pipeline_mode = #tpu.pipeline_mode<synchronous>, transform_indices = @transform_2, window_bounds = array<i64: 6, 1>}, {transform_indices = @transform_3, window_bounds = array<i64: 1, 6, 512>}]} {
    %c0 = arith.constant 0 : index
    %c0_0 = arith.constant 0 : index
    %c0_1 = arith.constant 0 : index
    %0 = vector.load %arg1[%c0, %c0_0, %c0_1] : memref<1x4x640xf32, #tpu.memory_space<vmem>>, vector<1x4x640xf32>
    %1 = vector.shape_cast %0 : vector<1x4x640xf32> to vector<4x640xf32>
    %2 = vector.extract_strided_slice %1 {offsets = [0, 0], sizes = [4, 512], strides = [1, 1]} : vector<4x640xf32> to vector<4x512xf32>
    %c0_2 = arith.constant 0 : index
    %c0_3 = arith.constant 0 : index
    %3 = vector.load %arg5[%c0_2, %c0_3] : memref<100x512xf32, #tpu.memory_space<vmem>>, vector<4x512xf32>
    tpu.vector_store %arg5[%c0_2, %c0_3], %2 {strides = array<i32>} : memref<100x512xf32, #tpu.memory_space<vmem>>, vector<4x512xf32>,
    %4 = vector.extract_strided_slice %1 {offsets = [0, 1], sizes = [4, 512], strides = [1, 1]} : vector<4x640xf32> to vector<4x512xf32>
    %c4 = arith.constant 4 : index
    %c0_4 = arith.constant 0 : index
    %5 = vector.load %arg5[%c4, %c0_4] : memref<100x512xf32, #tpu.memory_space<vmem>>, vector<4x512xf32>
    tpu.vector_store %arg5[%c4, %c0_4], %4 {strides = array<i32>} : memref<100x512xf32, #tpu.memory_space<vmem>>, vector<4x512xf32>,
    %6 = vector.extract_strided_slice %1 {offsets = [0, 2], sizes = [4, 512], strides = [1, 1]} : vector<4x640xf32> to vector<4x512xf32>
    %c8 = arith.constant 8 : index
    %c0_5 = arith.constant 0 : index
    %7 = vector.load %arg5[%c8, %c0_5] : memref<100x512xf32, #tpu.memory_space<vmem>>, vector<4x512xf32>
    tpu.vector_store %arg5[%c8, %c0_5], %6 {strides = array<i32>} : memref<100x512xf32, #tpu.memory_space<vmem>>, vector<4x512xf32>,
    %8 = vector.extract_strided_slice %1 {offsets = [0, 3], sizes = [4, 512], strides = [1, 1]} : vector<4x640xf32> to vector<4x512xf32>
    %c12 = arith.constant 12 : index
    %c0_6 = arith.constant 0 : index
    %9 = vector.load %arg5[%c12, %c0_6] : memref<100x512xf32, #tpu.memory_space<vmem>>, vector<4x512xf32>
    tpu.vector_store %arg5[%c12, %c0_6], %8 {strides = array<i32>} : memref<100x512xf32, #tpu.memory_space<vmem>>, vector<4x512xf32>,
    %10 = vector.extract_strided_slice %1 {offsets = [0, 4], sizes = [4, 512], strides = [1, 1]} : vector<4x640xf32> to vector<4x512xf32>
    %c16 = arith.constant 16 : index
    %c0_7 = arith.constant 0 : index
    %11 = vector.load %arg5[%c16, %c0_7] : memref<100x512xf32, #tpu.memory_space<vmem>>, vector<4x512xf32>
    tpu.vector_store %arg5[%c16, %c0_7], %10 {strides = array<i32>} : memref<100x512xf32, #tpu.memory_space<vmem>>, vector<4x512xf32>,
    %12 = vector.extract_strided_slice %1 {offsets = [0, 20], sizes = [4, 512], strides = [1, 1]} : vector<4x640xf32> to vector<4x512xf32>
    %c20 = arith.constant 20 : index
    %c0_8 = arith.constant 0 : index
    %13 = vector.load %arg5[%c20, %c0_8] : memref<100x512xf32, #tpu.memory_space<vmem>>, vector<4x512xf32>
    tpu.vector_store %arg5[%c20, %c0_8], %12 {strides = array<i32>} : memref<100x512xf32, #tpu.memory_space<vmem>>, vector<4x512xf32>,
    %14 = vector.extract_strided_slice %1 {offsets = [0, 21], sizes = [4, 512], strides = [1, 1]} : vector<4x640xf32> to vector<4x512xf32>
    %c24 = arith.constant 24 : index
    %c0_9 = arith.constant 0 : index
    %15 = vector.load %arg5[%c24, %c0_9] : memref<100x512xf32, #tpu.memory_space<vmem>>, vector<4x512xf32>
    tpu.vector_store %arg5[%c24, %c0_9], %14 {strides = array<i32>} : memref<100x512xf32, #tpu.memory_space<vmem>>, vector<4x512xf32>,
    %16 = vector.extract_strided_slice %1 {offsets = [0, 22], sizes = [4, 512], strides = [1, 1]} : vector<4x640xf32> to vector<4x512xf32>
    %c28 = arith.constant 28 : index
    %c0_10 = arith.constant 0 : index
    %17 = vector.load %arg5[%c28, %c0_10] : memref<100x512xf32, #tpu.memory_space<vmem>>, vector<4x512xf32>
    tpu.vector_store %arg5[%c28, %c0_10], %16 {strides = array<i32>} : memref<100x512xf32, #tpu.memory_space<vmem>>, vector<4x512xf32>,
    %18 = vector.extract_strided_slice %1 {offsets = [0, 23], sizes = [4, 512], strides = [1, 1]} : vector<4x640xf32> to vector<4x512xf32>
    %c32 = arith.constant 32 : index
    %c0_11 = arith.constant 0 : index
    %19 = vector.load %arg5[%c32, %c0_11] : memref<100x512xf32, #tpu.memory_space<vmem>>, vector<4x512xf32>
    tpu.vector_store %arg5[%c32, %c0_11], %18 {strides = array<i32>} : memref<100x512xf32, #tpu.memory_space<vmem>>, vector<4x512xf32>,
    %20 = vector.extract_strided_slice %1 {offsets = [0, 24], sizes = [4, 512], strides = [1, 1]} : vector<4x640xf32> to vector<4x512xf32>
    %c36 = arith.constant 36 : index
    %c0_12 = arith.constant 0 : index
    %21 = vector.load %arg5[%c36, %c0_12] : memref<100x512xf32, #tpu.memory_space<vmem>>, vector<4x512xf32>
    tpu.vector_store %arg5[%c36, %c0_12], %20 {strides = array<i32>} : memref<100x512xf32, #tpu.memory_space<vmem>>, vector<4x512xf32>,
    %22 = vector.extract_strided_slice %1 {offsets = [0, 40], sizes = [4, 512], strides = [1, 1]} : vector<4x640xf32> to vector<4x512xf32>
    %c40 = arith.constant 40 : index
    %c0_13 = arith.constant 0 : index
    %23 = vector.load %arg5[%c40, %c0_13] : memref<100x512xf32, #tpu.memory_space<vmem>>, vector<4x512xf32>
    tpu.vector_store %arg5[%c40, %c0_13], %22 {strides = array<i32>} : memref<100x512xf32, #tpu.memory_space<vmem>>, vector<4x512xf32>,
    %24 = vector.extract_strided_slice %1 {offsets = [0, 41], sizes = [4, 512], strides = [1, 1]} : vector<4x640xf32> to vector<4x512xf32>
    %c44 = arith.constant 44 : index
    %c0_14 = arith.constant 0 : index
    %25 = vector.load %arg5[%c44, %c0_14] : memref<100x512xf32, #tpu.memory_space<vmem>>, vector<4x512xf32>
    tpu.vector_store %arg5[%c44, %c0_14], %24 {strides = array<i32>} : memref<100x512xf32, #tpu.memory_space<vmem>>, vector<4x512xf32>,
    %26 = vector.extract_strided_slice %1 {offsets = [0, 42], sizes = [4, 512], strides = [1, 1]} : vector<4x640xf32> to vector<4x512xf32>
    %c48 = arith.constant 48 : index
    %c0_15 = arith.constant 0 : index
    %27 = vector.load %arg5[%c48, %c0_15] : memref<100x512xf32, #tpu.memory_space<vmem>>, vector<4x512xf32>
    tpu.vector_store %arg5[%c48, %c0_15], %26 {strides = array<i32>} : memref<100x512xf32, #tpu.memory_space<vmem>>, vector<4x512xf32>,
    %28 = vector.extract_strided_slice %1 {offsets = [0, 43], sizes = [4, 512], strides = [1, 1]} : vector<4x640xf32> to vector<4x512xf32>
    %c52 = arith.constant 52 : index
    %c0_16 = arith.constant 0 : index
    %29 = vector.load %arg5[%c52, %c0_16] : memref<100x512xf32, #tpu.memory_space<vmem>>, vector<4x512xf32>
    tpu.vector_store %arg5[%c52, %c0_16], %28 {strides = array<i32>} : memref<100x512xf32, #tpu.memory_space<vmem>>, vector<4x512xf32>,
    %30 = vector.extract_strided_slice %1 {offsets = [0, 44], sizes = [4, 512], strides = [1, 1]} : vector<4x640xf32> to vector<4x512xf32>
    %c56 = arith.constant 56 : index
    %c0_17 = arith.constant 0 : index
    %31 = vector.load %arg5[%c56, %c0_17] : memref<100x512xf32, #tpu.memory_space<vmem>>, vector<4x512xf32>
    tpu.vector_store %arg5[%c56, %c0_17], %30 {strides = array<i32>} : memref<100x512xf32, #tpu.memory_space<vmem>>, vector<4x512xf32>,
    %32 = vector.extract_strided_slice %1 {offsets = [0, 60], sizes = [4, 512], strides = [1, 1]} : vector<4x640xf32> to vector<4x512xf32>
    %c60 = arith.constant 60 : index
    %c0_18 = arith.constant 0 : index
    %33 = vector.load %arg5[%c60, %c0_18] : memref<100x512xf32, #tpu.memory_space<vmem>>, vector<4x512xf32>
    tpu.vector_store %arg5[%c60, %c0_18], %32 {strides = array<i32>} : memref<100x512xf32, #tpu.memory_space<vmem>>, vector<4x512xf32>,
    %34 = vector.extract_strided_slice %1 {offsets = [0, 61], sizes = [4, 512], strides = [1, 1]} : vector<4x640xf32> to vector<4x512xf32>
    %c64 = arith.constant 64 : index
    %c0_19 = arith.constant 0 : index
    %35 = vector.load %arg5[%c64, %c0_19] : memref<100x512xf32, #tpu.memory_space<vmem>>, vector<4x512xf32>
    tpu.vector_store %arg5[%c64, %c0_19], %34 {strides = array<i32>} : memref<100x512xf32, #tpu.memory_space<vmem>>, vector<4x512xf32>,
    %36 = vector.extract_strided_slice %1 {offsets = [0, 62], sizes = [4, 512], strides = [1, 1]} : vector<4x640xf32> to vector<4x512xf32>
    %c68 = arith.constant 68 : index
    %c0_20 = arith.constant 0 : index
    %37 = vector.load %arg5[%c68, %c0_20] : memref<100x512xf32, #tpu.memory_space<vmem>>, vector<4x512xf32>
    tpu.vector_store %arg5[%c68, %c0_20], %36 {strides = array<i32>} : memref<100x512xf32, #tpu.memory_space<vmem>>, vector<4x512xf32>,
    %38 = vector.extract_strided_slice %1 {offsets = [0, 63], sizes = [4, 512], strides = [1, 1]} : vector<4x640xf32> to vector<4x512xf32>
    %c72 = arith.constant 72 : index
    %c0_21 = arith.constant 0 : index
    %39 = vector.load %arg5[%c72, %c0_21] : memref<100x512xf32, #tpu.memory_space<vmem>>, vector<4x512xf32>
    tpu.vector_store %arg5[%c72, %c0_21], %38 {strides = array<i32>} : memref<100x512xf32, #tpu.memory_space<vmem>>, vector<4x512xf32>,
    %40 = vector.extract_strided_slice %1 {offsets = [0, 64], sizes = [4, 512], strides = [1, 1]} : vector<4x640xf32> to vector<4x512xf32>
    %c76 = arith.constant 76 : index
    %c0_22 = arith.constant 0 : index
    %41 = vector.load %arg5[%c76, %c0_22] : memref<100x512xf32, #tpu.memory_space<vmem>>, vector<4x512xf32>
    tpu.vector_store %arg5[%c76, %c0_22], %40 {strides = array<i32>} : memref<100x512xf32, #tpu.memory_space<vmem>>, vector<4x512xf32>,
    %42 = vector.extract_strided_slice %1 {offsets = [0, 80], sizes = [4, 512], strides = [1, 1]} : vector<4x640xf32> to vector<4x512xf32>
    %c80 = arith.constant 80 : index
    %c0_23 = arith.constant 0 : index
    %43 = vector.load %arg5[%c80, %c0_23] : memref<100x512xf32, #tpu.memory_space<vmem>>, vector<4x512xf32>
    tpu.vector_store %arg5[%c80, %c0_23], %42 {strides = array<i32>} : memref<100x512xf32, #tpu.memory_space<vmem>>, vector<4x512xf32>,
    %44 = vector.extract_strided_slice %1 {offsets = [0, 81], sizes = [4, 512], strides = [1, 1]} : vector<4x640xf32> to vector<4x512xf32>
    %c84 = arith.constant 84 : index
    %c0_24 = arith.constant 0 : index
    %45 = vector.load %arg5[%c84, %c0_24] : memref<100x512xf32, #tpu.memory_space<vmem>>, vector<4x512xf32>
    tpu.vector_store %arg5[%c84, %c0_24], %44 {strides = array<i32>} : memref<100x512xf32, #tpu.memory_space<vmem>>, vector<4x512xf32>,
    %46 = vector.extract_strided_slice %1 {offsets = [0, 82], sizes = [4, 512], strides = [1, 1]} : vector<4x640xf32> to vector<4x512xf32>
    %c88 = arith.constant 88 : index
    %c0_25 = arith.constant 0 : index
    %47 = vector.load %arg5[%c88, %c0_25] : memref<100x512xf32, #tpu.memory_space<vmem>>, vector<4x512xf32>
    tpu.vector_store %arg5[%c88, %c0_25], %46 {strides = array<i32>} : memref<100x512xf32, #tpu.memory_space<vmem>>, vector<4x512xf32>,
    %48 = vector.extract_strided_slice %1 {offsets = [0, 83], sizes = [4, 512], strides = [1, 1]} : vector<4x640xf32> to vector<4x512xf32>
    %c92 = arith.constant 92 : index
    %c0_26 = arith.constant 0 : index
    %49 = vector.load %arg5[%c92, %c0_26] : memref<100x512xf32, #tpu.memory_space<vmem>>, vector<4x512xf32>
    tpu.vector_store %arg5[%c92, %c0_26], %48 {strides = array<i32>} : memref<100x512xf32, #tpu.memory_space<vmem>>, vector<4x512xf32>,
    %50 = vector.extract_strided_slice %1 {offsets = [0, 84], sizes = [4, 512], strides = [1, 1]} : vector<4x640xf32> to vector<4x512xf32>
    %c96 = arith.constant 96 : index
    %c0_27 = arith.constant 0 : index
    %51 = vector.load %arg5[%c96, %c0_27] : memref<100x512xf32, #tpu.memory_space<vmem>>, vector<4x512xf32>
    tpu.vector_store %arg5[%c96, %c0_27], %50 {strides = array<i32>} : memref<100x512xf32, #tpu.memory_space<vmem>>, vector<4x512xf32>,
    %c0_28 = arith.constant 0 : index
    %c0_29 = arith.constant 0 : index
    %52 = vector.load %arg2[%c0_28, %c0_29] : memref<6x100xf32, #tpu.memory_space<vmem>>, vector<6x100xf32>
    %c0_30 = arith.constant 0 : index
    %c0_31 = arith.constant 0 : index
    %53 = vector.load %arg5[%c0_30, %c0_31] : memref<100x512xf32, #tpu.memory_space<vmem>>, vector<100x512xf32>
    %cst = arith.constant dense<0.000000e+00> : vector<6x512xf32>
    %54 = tpu.matmul %52, %53, %cst {dimension_numbers = #tpu.dot_dimension_numbers<[1], [0], [0], [1], [0, 0, 1, 1], [], []>} : vector<6x100xf32>, vector<100x512xf32>, vector<6x512xf32> -> vector<6x512xf32>
    %c0_32 = arith.constant 0 : index
    %c0_33 = arith.constant 0 : index
    %55 = vector.load %arg3[%c0_32, %c0_33] : memref<6x1xf32, #tpu.memory_space<vmem>>, vector<6x1xf32>
    %56 = vector.broadcast %55 : vector<6x1xf32> to vector<6x512xf32>
    %57 = arith.addf %54, %56 : vector<6x512xf32>
    %c0_34 = arith.constant 0 : index
    %c0_35 = arith.constant 0 : index
    %c0_36 = arith.constant 0 : index
    %58 = vector.load %arg4[%c0_34, %c0_35, %c0_36] : memref<1x6x512xf32, #tpu.memory_space<vmem>>, vector<1x6x512xf32>
    %59 = vector.shape_cast %58 : vector<1x6x512xf32> to vector<6x512xf32>
    %60 = vector.shape_cast %57 : vector<6x512xf32> to vector<1x6x512xf32>
    tpu.vector_store %arg4[%c0_34, %c0_35, %c0_36], %60 {strides = array<i32>} : memref<1x6x512xf32, #tpu.memory_space<vmem>>, vector<1x6x512xf32>,
    return
  }
  func.func @transform_0(%arg0: i32) -> (i32, i32, i32) {
    %c0_i32 = arith.constant 0 : i32
    %c0_i32_0 = arith.constant 0 : i32
    %c0_i32_1 = arith.constant 0 : i32
    return %arg0, %c0_i32, %c0_i32_0 : i32, i32, i32
  }
  func.func @transform_1(%arg0: i32) -> (i32, i32) {
    %c0_i32 = arith.constant 0 : i32
    %c0_i32_0 = arith.constant 0 : i32
    %c0_i32_1 = arith.constant 0 : i32
    return %c0_i32, %c0_i32_0 : i32, i32
  }
  func.func @transform_2(%arg0: i32) -> (i32, i32) {
    %c0_i32 = arith.constant 0 : i32
    %c0_i32_0 = arith.constant 0 : i32
    %c0_i32_1 = arith.constant 0 : i32
    return %c0_i32, %c0_i32_0 : i32, i32
  }
  func.func @transform_3(%arg0: i32) -> (i32, i32, i32) {
    %c0_i32 = arith.constant 0 : i32
    %c0_i32_0 = arith.constant 0 : i32
    %c0_i32_1 = arith.constant 0 : i32
    return %arg0, %c0_i32, %c0_i32_0 : i32, i32, i32
  }
}

</mosaic_0001>

<bundles_post_ra>
// kernel: tpu_custom_call.1
= control target key start
LH: loop header
LB: loop body
LE: loop exit
PB: predicated region body
PF: predicated region fallthrough
CT: control target
= control target key end

     0   :  { %8 = vsyncpa [#allocation4], 0  ;;  %s1623_s0 = inlined_call_operand.hbm [shape: f32[2,4,640], index: 0, kind: input, shape index: {}]   ;;  %s1624_s1 = inlined_call_operand.vmem [shape: f32[6,100], index: 1, kind: input, shape index: {}]   ;;  %s1625_s2 = inlined_call_operand.vmem [shape: f32[6,1], index: 2, kind: input, shape index: {}]   ;;  %s1626_s3 = inlined_call_operand.vmem [shape: f32[2,6,512], index: 3, kind: output, shape index: {}]  }
   0x1   :  { %10 = vsyncpa [#allocation4 + $0x1], 0  ;;  %s1248_s12 = smov 0   ;;  %s1250_s13 = smov 0  }
   0x2   :  { %s1252_s14 = smov 0   ;;  %s1254_s15 = smov 0  }
   0x3 LB: > { %s1267_s16 = sadd.s32 4294967295, %s1199_s15   ;;  %s1270_s17 = sadd.s32 1, %s1199_s15   ;;  %s1199_s15 = sphi %s1254_s15, %s1635_s15   ;;  %s1195_s14 = sphi %s1252_s14, %s1634_s14   ;;  %s1191_s13 = sphi %s1250_s13, %s1633_s13   ;;  %s1187_s12 = sphi %s1248_s12, %s1632_s12  }
   0x4   : > { %s20_s18 = ssub.s32 %s1199_s15, %s1270_s17  ;;  %s23_s19 = sadd.s32 1, %s1195_s14 }
   0x5   : > { %p21_p0 = scmp.eq.s32.totalorder %s20_s18, 0  ;;  %p30_p1 = scmp.ne.s32.totalorder %s1195_s14, %s1191_s13 }
   0x6   : > { %p31_p2 = scmp.eq.s32.totalorder %s1199_s15, 0  ;;  %p36_p3 = scmp.ne.s32.totalorder %s1191_s13, %s1187_s12 }
   0x7   : > { %s1280_s20 = scalar_select %p21_p0, %s1195_s14, %s23_s19  }
   0x8   : > { %p32_p4 = por %p31_p2, %p30_p1  ;;  %p37_p5 = scmp.eq.s32.totalorder %s1267_s16, 0 }
   0x9   : > { %p1072_p6 = scmp.lt.s32.totalorder %s1199_s15, 2  ;;  %s134_s22 = sand.u32 1, %s1195_s14  }
   0xa   : > { %p1284_p7 = por %p37_p5, %p36_p3  ;;  %s1063_s23 = smul.u32 20, %s134_s22 }
   0xb   : > { %s1064_s24 = smul.u32 320, %s1199_s15  ;;  %p1290_p8 = pnand %p1072_p6, %p32_p4 }
   0xc   : > { %s1628_s21 = scalar_select %p1284_p7, 1, 0 }
   0xd   : > { %s1298_s28 = scalar_lea.hbm %s1623_s0, %s1064_s24  ;;  %s138_s29 = scalar_lea.vmem [#allocation3], %s1063_s23 }
   0xe   : > { %s146_s30 = sshll.u32 %s138_s29, 4  ;;  %s135_s4 = scalar_lea.sflag [#allocation4], %s134_s22  ;;  %s147_s30 = int_to_ptr.vmem [resolvable:$true] %s146_s30 }
   0xf   : > { %s1137_s5 = scalar_lea.hbm %s1298_s28, 320  ;;  %p1139_p11 = pneg %p1290_p8 }
  0x10   : > { %p1138_p10 = scmp.ne.s32.totalorder %s1298_s28, %s1137_s5  ;;  %s1142_s8 = scalar_lea.hbm %s1623_s0, 640 }
  0x11   : > { %p1143_p0 = scmp.lt.s32.totalorder %s1298_s28, %s1623_s0  ;;  %p1144_p1 = scmp.lt.s32.totalorder %s1142_s8, %s1137_s5 }
  0x12   : > { %p1140_p12 = pnand %p1139_p11, %p1138_p10 }
  0x13   : > { %p1145_p2 = por %p1144_p1, %p1143_p0 }
  0x14   : > { %p1141_p13 = pneg %p1140_p12 }
  0x16   : > { %p1146_p3 = pnand %p1145_p2, %p1141_p13 }
  0x18   : > { %1149 = shalt.err (!%p1146_p3)
}
  0x19   : > { %s1150_s11 = scalar_lea.vmem %s147_s30, 320  ;;  %s1201_s12 = smov [#allocation3]  }
  0x1a   : > { %p1151_p4 = scmp.ne.s32.totalorder %s147_s30, %s1150_s11  ;;  %s1155_s18 = sshll.u32 %s1201_s12, 4  ;;  %s1156_s18 = int_to_ptr.vmem [resolvable:$false] %s1155_s18 }
  0x1b   : > { %s1157_s19 = scalar_lea.vmem %s1156_s18, 640  ;;  %p1158_p10 = scmp.lt.s32.totalorder %s147_s30, %s1156_s18 }
  0x1c   : > { %p1153_p5 = pnand %p1151_p4, %p1139_p11  ;;  %p1159_p12 = scmp.lt.s32.totalorder %s1157_s19, %s1150_s11 }
  0x1e   : > { %p1154_p6 = pneg %p1153_p5  ;;  %p1160_p9 = por %p1159_p12, %p1158_p10 }
  0x20   : > { %p1161_p7 = pnand %p1160_p9, %p1154_p6 }
  0x22   : > { %1164 = shalt.err (!%p1161_p7)
}
  0x23   : > { %1071 = dma.hbm_to_vmem [thread:$0]  (!%p1290_p8), %s1298_s28, 320, %s147_s30, %s135_s4  }
  0x24   : > { %p151_p13 = scmp.lt.s32.totalorder %s1199_s15, 3  ;;  %p1630_p0 = scmp.ge.s32.totalorder %s1199_s15, 1 }
  0x26   : > { %p152_p1 = pnand %p1630_p0, %p151_p13 }
  0x27   : > { %s157_s22 = sand.u32 (!%p152_p1), 1, %s1191_s13   ;;  %p1631_p11 = scmp.ne.s32.totalorder (!%p152_p1), %s1628_s21, 0 }
  0x28   : > { %155 = sbr.rel (%p152_p1) target bundleno = 608 (0x260), region = 32  ;;  %s158_s24 = scalar_lea.sflag (!%p152_p1), [#allocation4], %s157_s22 }
  0x29   : > { %s1065_s23 = smul.u32 (!%p152_p1), 20, %s157_s22 }
  0x2b   : > { %s161_s26 = scalar_lea.vmem (!%p152_p1), [#allocation3], %s1065_s23 }
  0x2d   : > { %1182 = dma.done.wait (%p1631_p11), %s158_s24, 320  }
  0x2e   : > { %1184 = vsyncadd (%p1631_p11), %s158_s24, 4294966976  ;;  %v1322_v0 = vld [vmem:[%s161_s26 + $0x10] sm:$0xf]  ;;  %v1324_v1 = vld [vmem:[%s161_s26 + $0x8] sm:$0xff]  ;;  %s1202_s15 = smov 44   ;;  %s1203_s21 = smov 46  }
  0x2f   : > { %v1326_v2 = vld [vmem:[%s161_s26] sm:$0xff]  ;;  %743 = vrot.lane.b32.xlu1 %v1322_v0, %s1202_s15  ;;  %739 = vrot.lane.b32.xlu0 %v1324_v1, %s1202_s15  ;;  %200 = vst [vmem:[#allocation2 + $0x10] sm:$0xf] %v1324_v1  ;;  %v1333_v3 = vcombine.high %v1324_v1, %v1324_v1  ;;  %s1204_s25 = smov 45   ;;  %v1352_v5 = vcombine.low %v1324_v1, %v1324_v1  ;;  %s1205_s27 = smov 48   ;;  %vm745_vm0 = vcmask 359424  }
  0x30   : > { %198 = vst [vmem:[#allocation2 + $0xb0] sm:$0xf] %v1326_v2  ;;  %v1338_v4 = vcombine.high %v1326_v2, %v1326_v2  ;;  %v1358_v6 = vcombine.low %v1322_v0, %v1322_v0  ;;  %v1364_v7 = vcombine.low %v1326_v2, %v1326_v2  ;;  %s1206_s28 = smov 47   ;;  %s1207_s29 = smov 65   ;;  %vm699_vm1 = vcmask 375808  }
  0x31   : > { %201 = vst [vmem:[#allocation2 + $0x48] sm:$0xf] %v1333_v3  ;;  %s1208_s30 = smov 64   ;;  %s1209_s4 = smov 67   ;;  %vm821_vm2 = vcmask 1043456   ;;  %vm722_vm3 = vcmask 367616  }
  0x32   : > { %199 = vst [vmem:[#allocation2 + $0xd0] sm:$0xf] %v1338_v4  ;;  %s1210_s5 = smov 66   ;;  %s1211_s6 = smov 84   ;;  %vm653_vm4 = vcmask 392192   ;;  %vm676_vm5 = vcmask 384000  }
  0x33   : > { %741 = vrot.lane.b32.xlu1 %v1333_v3, %s1202_s15  ;;  %735 = vrot.lane.b32.xlu0 %v1326_v2, %s1202_s15  ;;  %s1212_s7 = smov 68   ;;  %s1213_s8 = smov 86   ;;  %vm607_vm6 = vcmask 531456   ;;  %vm630_vm7 = vcmask 523264   ;;  %vm561_vm8 = vcmask 547840   ;;  %vm584_vm9 = vcmask 539648  }
  0x34   : > { %s1214_s9 = smov 85   ;;  %s1215_s10 = smov 88   ;;  %vm515_vm10 = vcmask 687104   ;;  %vm538_vm11 = vcmask 556032   ;;  %vm469_vm12 = vcmask 703488   ;;  %vm492_vm13 = vcmask 695296  }
  0x35   : > { %s1216_s11 = smov 87   ;;  %s1217_s12 = smov 105   ;;  %vm423_vm14 = vcmask 719872   ;;  %vm446_vm15 = vcmask 711680  }
  0x36   : > { %s1218_s18 = smov 104   ;;  %s1219_s19 = smov 107  }
  0x37   : > { %691 = vrot.lane.b32.xlu1 %v1338_v4, %s1203_s21  ;;  %737 = vrot.lane.b32.xlu0 %v1338_v4, %s1202_s15  ;;  %s1220_s22 = smov 106   ;;  %s1221_s23 = smov 124  }
  0x38   : > { %s1222_s24 = smov 108   ;;  %s1223_s26 = smov 126  }
  0x39   : > { %s1224_s15 = smov 125   ;;  %p184_p7 = scmp.lt.s32.totalorder %s1267_s16, 1 }
  0x3b   : > { %695 = vrot.lane.b32.xlu1 %v1333_v3, %s1203_s21  ;;  %693 = vrot.lane.b32.xlu0 %v1324_v1, %s1203_s21  ;;  %s1637_s16 = smov (!%p184_p7, %s1267_s16), 1 }
  0x3f   : > { %714 = vrot.lane.b32.xlu1 %v1326_v2, %s1204_s25  ;;  %697 = vrot.lane.b32.xlu0 %v1322_v0, %s1203_s21 }
  0x43   : > { %718 = vrot.lane.b32.xlu1 %v1324_v1, %s1204_s25  ;;  %716 = vrot.lane.b32.xlu0 %v1352_v5, %s1204_s25 }
  0x47   : > { %689 = vrot.lane.b32.xlu1 %v1326_v2, %s1203_s21  ;;  %720 = vrot.lane.b32.xlu0 %v1358_v6, %s1204_s25  ;;  %s1225_s21 = smov 127  }
  0x4b   : > { %645 = vrot.lane.b32.xlu1 %v1338_v4, %s1205_s27  ;;  %712 = vrot.lane.b32.xlu0 %v1364_v7, %s1204_s25 }
  0x4f   : > { %649 = vrot.lane.b32.xlu1 %v1333_v3, %s1205_s27  ;;  %647 = vrot.lane.b32.xlu0 %v1324_v1, %s1205_s27 }
  0x53   : > { %668 = vrot.lane.b32.xlu1 %v1326_v2, %s1206_s28  ;;  %651 = vrot.lane.b32.xlu0 %v1322_v0, %s1205_s27 }
  0x57   : > { %672 = vrot.lane.b32.xlu1 %v1324_v1, %s1206_s28  ;;  %670 = vrot.lane.b32.xlu0 %v1352_v5, %s1206_s28 }
  0x5b   : > { %643 = vrot.lane.b32.xlu1 %v1326_v2, %s1205_s27  ;;  %674 = vrot.lane.b32.xlu0 %v1358_v6, %s1206_s28 }
  0x5f   : > { %599 = vrot.lane.b32.xlu1 %v1338_v4, %s1207_s29  ;;  %666 = vrot.lane.b32.xlu0 %v1364_v7, %s1206_s28 }
  0x63   : > { %603 = vrot.lane.b32.xlu1 %v1333_v3, %s1207_s29  ;;  %601 = vrot.lane.b32.xlu0 %v1324_v1, %s1207_s29 }
  0x67   : > { %622 = vrot.lane.b32.xlu1 %v1326_v2, %s1208_s30  ;;  %605 = vrot.lane.b32.xlu0 %v1322_v0, %s1207_s29 }
  0x6b   : > { %626 = vrot.lane.b32.xlu1 %v1324_v1, %s1208_s30  ;;  %624 = vrot.lane.b32.xlu0 %v1352_v5, %s1208_s30 }
  0x6f   : > { %597 = vrot.lane.b32.xlu1 %v1326_v2, %s1207_s29  ;;  %628 = vrot.lane.b32.xlu0 %v1358_v6, %s1208_s30 }
  0x73   : > { %553 = vrot.lane.b32.xlu1 %v1338_v4, %s1209_s4  ;;  %620 = vrot.lane.b32.xlu0 %v1364_v7, %s1208_s30  ;;  %s1062_s30 = sshll.u32 %s1637_s16, 5 }
  0x77   : > { %557 = vrot.lane.b32.xlu1 %v1333_v3, %s1209_s4  ;;  %555 = vrot.lane.b32.xlu0 %v1324_v1, %s1209_s4 }
  0x7b   : > { %576 = vrot.lane.b32.xlu1 %v1326_v2, %s1210_s5  ;;  %559 = vrot.lane.b32.xlu0 %v1322_v0, %s1209_s4 }
  0x7f   : > { %580 = vrot.lane.b32.xlu1 %v1324_v1, %s1210_s5  ;;  %578 = vrot.lane.b32.xlu0 %v1352_v5, %s1210_s5 }
  0x83   : > { %551 = vrot.lane.b32.xlu1 %v1326_v2, %s1209_s4  ;;  %582 = vrot.lane.b32.xlu0 %v1358_v6, %s1210_s5 }
  0x87   : > { %507 = vrot.lane.b32.xlu1 %v1338_v4, %s1211_s6  ;;  %574 = vrot.lane.b32.xlu0 %v1364_v7, %s1210_s5 }
  0x8b   : > { %511 = vrot.lane.b32.xlu1 %v1333_v3, %s1211_s6  ;;  %509 = vrot.lane.b32.xlu0 %v1324_v1, %s1211_s6 }
  0x8f   : > { %530 = vrot.lane.b32.xlu1 %v1326_v2, %s1212_s7  ;;  %513 = vrot.lane.b32.xlu0 %v1322_v0, %s1211_s6 }
  0x93   : > { %534 = vrot.lane.b32.xlu1 %v1324_v1, %s1212_s7  ;;  %532 = vrot.lane.b32.xlu0 %v1352_v5, %s1212_s7 }
  0x97   : > { %505 = vrot.lane.b32.xlu1 %v1326_v2, %s1211_s6  ;;  %536 = vrot.lane.b32.xlu0 %v1358_v6, %s1212_s7  ;;  %s188_s6 = scalar_lea.vmem %s1626_s3, %s1062_s30 }
  0x9b   : > { %461 = vrot.lane.b32.xlu1 %v1338_v4, %s1213_s8  ;;  %528 = vrot.lane.b32.xlu0 %v1364_v7, %s1212_s7 }
  0x9f   : > { %465 = vrot.lane.b32.xlu1 %v1333_v3, %s1213_s8  ;;  %463 = vrot.lane.b32.xlu0 %v1324_v1, %s1213_s8 }
  0xa1   : > { %v744_v8 = vpop.permute.xlu1 %743  ;;  %v740_v9 = vpop.permute.xlu0 %739 }
  0xa3   : > { %484 = vrot.lane.b32.xlu1 %v1326_v2, %s1214_s9  ;;  %467 = vrot.lane.b32.xlu0 %v1322_v0, %s1213_s8 }
  0xa5   : > { %v742_v10 = vpop.permute.xlu1 %741  ;;  %v736_v11 = vpop.permute.xlu0 %735 }
  0xa6   : > { %v748_v12 = vsel %vm745_vm0, %v740_v9, %v742_v10  ;;  %v749_v13 = vsel %vm745_vm0, %v742_v10, %v744_v8 }
  0xa7   : > { %756 = vst [vmem:[#allocation2 + $0xe8] sm:$0xf] %v748_v12  ;;  %757 = vst [vmem:[#allocation2 + $0x70] sm:$0xf] %v749_v13  ;;  %488 = vrot.lane.b32.xlu1 %v1324_v1, %s1214_s9  ;;  %486 = vrot.lane.b32.xlu0 %v1352_v5, %s1214_s9 }
  0xa9   : > { %v692_v14 = vpop.permute.xlu1 %691  ;;  %v738_v15 = vpop.permute.xlu0 %737 }
  0xaa   : > { %v746_v16 = vsel %vm745_vm0, %v736_v11, %v738_v15  ;;  %v747_v17 = vsel %vm745_vm0, %v738_v15, %v740_v9  ;;  %vm377_vm0 = vcmask 859136  }
  0xab   : > { %754 = vst [vmem:[#allocation2 + $0x98] sm:$0xf] %v746_v16  ;;  %755 = vst [vmem:[#allocation2 + $0x150] sm:$0xf] %v747_v17  ;;  %459 = vrot.lane.b32.xlu1 %v1326_v2, %s1213_s8  ;;  %490 = vrot.lane.b32.xlu0 %v1358_v6, %s1214_s9 }
  0xad   : > { %v696_v18 = vpop.permute.xlu1 %695  ;;  %v694_v19 = vpop.permute.xlu0 %693 }
  0xae   : > { %v701_v20 = vsel %vm699_vm1, %v692_v14, %v694_v19  ;;  %v702_v21 = vsel %vm699_vm1, %v694_v19, %v696_v18  ;;  %v810_v22 = vld [vmem:[#allocation2 + $0x70] sm:$0xf]  ;;  %v809_v23 = vld [vmem:[#allocation2 + $0xe8] sm:$0xf] }
  0xaf   : > { %709 = vst [vmem:[#allocation2 + $0x28] sm:$0xf] %v701_v20  ;;  %710 = vst [vmem:[#allocation2 + $0x8] sm:$0xf] %v702_v21  ;;  %1057 = vmatprep.subr.msk.mxu1 %vm821_vm2, %v810_v22  ;;  %415 = vrot.lane.b32.xlu1 %v1338_v4, %s1215_s10 }
  0xb0   : > { %482 = vrot.lane.b32.xlu0 %v1364_v7, %s1214_s9  ;;  %1058 = vmatpush1.msk.msra.mxu1 %vm821_vm2, %v809_v23 }
  0xb1   : > { %v715_v24 = vpop.permute.xlu1 %714  ;;  %v698_v25 = vpop.permute.xlu0 %697 }
  0xb2   : > { %v703_v26 = vsel %vm699_vm1, %v696_v18, %v698_v25  ;;  %v808_v27 = vld [vmem:[#allocation2 + $0x150] sm:$0xf]  ;;  %v807_v28 = vld [vmem:[#allocation2 + $0x98] sm:$0xf] }
  0xb3   : > { %711 = vst [vmem:[#allocation2 + $0x80] sm:$0xf] %v703_v26  ;;  %419 = vrot.lane.b32.xlu1 %v1333_v3, %s1215_s10  ;;  %1054 = vmatprep.subr.msk.mxu0 %vm821_vm2, %v808_v27 }
  0xb4   : > { %417 = vrot.lane.b32.xlu0 %v1324_v1, %s1215_s10  ;;  %1055 = vmatpush1.msk.msra.mxu0 %vm821_vm2, %v807_v28  ;;  %vm331_vm2 = vcmask 875520  }
  0xb5   : > { %v719_v29 = vpop.permute.xlu1 %718  ;;  %v717_v30 = vpop.permute.xlu0 %716 }
  0xb6   : > { %v724_v31 = vsel %vm722_vm3, %v715_v24, %v717_v30  ;;  %v725_v32 = vsel %vm722_vm3, %v717_v30, %v719_v29 }
  0xb7   : > { %732 = vst [vmem:[#allocation2 + $0x28] sm:$0xf0] %v724_v31  ;;  %733 = vst [vmem:[#allocation2 + $0x8] sm:$0xf0] %v725_v32  ;;  %438 = vrot.lane.b32.xlu1 %v1326_v2, %s1216_s11 }
  0xb8   : > { %421 = vrot.lane.b32.xlu0 %v1322_v0, %s1215_s10 }
  0xb9   : > { %v690_v33 = vpop.permute.xlu1 %689  ;;  %v721_v34 = vpop.permute.xlu0 %720 }
  0xba   : > { %v700_v35 = vsel %vm699_vm1, %v690_v33, %v692_v14  ;;  %v726_v36 = vsel %vm722_vm3, %v719_v29, %v721_v34  ;;  %vm400_vm1 = vcmask 850944  }
  0xbb   : > { %708 = vst [vmem:[#allocation2 + $0xf8] sm:$0xf] %v700_v35  ;;  %734 = vst [vmem:[#allocation2 + $0x80] sm:$0xf0] %v726_v36  ;;  %442 = vrot.lane.b32.xlu1 %v1324_v1, %s1216_s11 }
  0xbc   : > { %440 = vrot.lane.b32.xlu0 %v1352_v5, %s1216_s11 }
  0xbd   : > { %v646_v37 = vpop.permute.xlu1 %645  ;;  %v713_v38 = vpop.permute.xlu0 %712 }
  0xbe   : > { %v723_v39 = vsel %vm722_vm3, %v713_v38, %v715_v24  ;;  %v804_v40 = vld [vmem:[#allocation2 + $0x28] sm:$0xff]  ;;  %vm354_vm3 = vcmask 867328  }
  0xbf   : > { %731 = vst [vmem:[#allocation2 + $0xf8] sm:$0xf0] %v723_v39  ;;  %413 = vrot.lane.b32.xlu1 %v1326_v2, %s1215_s10  ;;  %842 = vmatprep.subr.mxu0 %v804_v40  ;;  %v805_v46 = vld [vmem:[#allocation2 + $0x8] sm:$0xff] }
  0xc0   : > { %444 = vrot.lane.b32.xlu0 %v1358_v6, %s1216_s11 }
  0xc1   : > { %v650_v41 = vpop.permute.xlu1 %649  ;;  %v648_v42 = vpop.permute.xlu0 %647 }
  0xc2   : > { %v655_v43 = vsel %vm653_vm4, %v646_v37, %v648_v42  ;;  %v656_v44 = vsel %vm653_vm4, %v648_v42, %v650_v41  ;;  %v806_v45 = vld [vmem:[#allocation2 + $0x80] sm:$0xff] }
  0xc3   : > { %663 = vst [vmem:[#allocation2 + $0x68] sm:$0xf] %v655_v43  ;;  %664 = vst [vmem:[#allocation2 + $0x30] sm:$0xf] %v656_v44  ;;  %369 = vrot.lane.b32.xlu1 %v1338_v4, %s1217_s12  ;;  %913 = vmatprep.subr.mxu1 %v806_v45 }
  0xc4   : > { %436 = vrot.lane.b32.xlu0 %v1364_v7, %s1216_s11  ;;  %914 = vmatpush1.msra.mxu1 %v805_v46 }
  0xc5   : > { %v669_v47 = vpop.permute.xlu1 %668  ;;  %v652_v48 = vpop.permute.xlu0 %651 }
  0xc6   : > { %v657_v49 = vsel %vm653_vm4, %v650_v41, %v652_v48  ;;  %v803_v50 = vld [vmem:[#allocation2 + $0xf8] sm:$0xff] }
  0xc7   : > { %665 = vst [vmem:[#allocation2 + $0xc8] sm:$0xf] %v657_v49  ;;  %373 = vrot.lane.b32.xlu1 %v1333_v3, %s1217_s12  ;;  %843 = vmatpush1.msra.mxu0 %v803_v50 }
  0xc8   : > { %371 = vrot.lane.b32.xlu0 %v1324_v1, %s1217_s12 }
  0xc9   : > { %v673_v51 = vpop.permute.xlu1 %672  ;;  %v671_v52 = vpop.permute.xlu0 %670 }
  0xca   : > { %v678_v53 = vsel %vm676_vm5, %v669_v47, %v671_v52  ;;  %v679_v54 = vsel %vm676_vm5, %v671_v52, %v673_v51 }
  0xcb   : > { %686 = vst [vmem:[#allocation2 + $0x68] sm:$0xf0] %v678_v53  ;;  %687 = vst [vmem:[#allocation2 + $0x30] sm:$0xf0] %v679_v54  ;;  %392 = vrot.lane.b32.xlu1 %v1326_v2, %s1218_s18 }
  0xcc   : > { %375 = vrot.lane.b32.xlu0 %v1322_v0, %s1217_s12 }
  0xcd   : > { %v644_v55 = vpop.permute.xlu1 %643  ;;  %v675_v56 = vpop.permute.xlu0 %674 }
  0xce   : > { %v654_v57 = vsel %vm653_vm4, %v644_v55, %v646_v37  ;;  %v680_v58 = vsel %vm676_vm5, %v673_v51, %v675_v56  ;;  %vm285_vm4 = vcmask 1014784  }
  0xcf   : > { %662 = vst [vmem:[#allocation2 + $0x198] sm:$0xf] %v654_v57  ;;  %688 = vst [vmem:[#allocation2 + $0xc8] sm:$0xf0] %v680_v58  ;;  %396 = vrot.lane.b32.xlu1 %v1324_v1, %s1218_s18 }
  0xd0   : > { %394 = vrot.lane.b32.xlu0 %v1352_v5, %s1218_s18 }
  0xd1   : > { %v600_v59 = vpop.permute.xlu1 %599  ;;  %v667_v60 = vpop.permute.xlu0 %666 }
  0xd2   : > { %v677_v61 = vsel %vm676_vm5, %v667_v60, %v669_v47  ;;  %v800_v62 = vld [vmem:[#allocation2 + $0x68] sm:$0xff]  ;;  %v801_v12 = vld [vmem:[#allocation2 + $0x30] sm:$0xff]  ;;  %vm308_vm5 = vcmask 883712  }
  0xd3   : > { %685 = vst [vmem:[#allocation2 + $0x198] sm:$0xf0] %v677_v61  ;;  %367 = vrot.lane.b32.xlu1 %v1326_v2, %s1217_s12  ;;  %844 = vmatprep.subr.mxu0 %v800_v62 }
  0xd4   : > { %398 = vrot.lane.b32.xlu0 %v1358_v6, %s1218_s18 }
  0xd5   : > { %v604_v63 = vpop.permute.xlu1 %603  ;;  %v602_v8 = vpop.permute.xlu0 %601 }
  0xd6   : > { %v609_v9 = vsel %vm607_vm6, %v600_v59, %v602_v8  ;;  %v610_v10 = vsel %vm607_vm6, %v602_v8, %v604_v63  ;;  %v802_v11 = vld [vmem:[#allocation2 + $0xc8] sm:$0xff] }
  0xd7   : > { %617 = vst [vmem:[#allocation2 + $0x18] sm:$0xf] %v609_v9  ;;  %618 = vst [vmem:[#allocation2 + $0x158] sm:$0xf] %v610_v10  ;;  %323 = vrot.lane.b32.xlu1 %v1338_v4, %s1219_s19  ;;  %915 = vmatprep.subr.mxu1 %v802_v11 }
  0xd8   : > { %390 = vrot.lane.b32.xlu0 %v1364_v7, %s1218_s18  ;;  %916 = vmatpush1.msra.mxu1 %v801_v12 }
  0xd9   : > { %v623_v13 = vpop.permute.xlu1 %622  ;;  %v606_v14 = vpop.permute.xlu0 %605 }
  0xda   : > { %v611_v15 = vsel %vm607_vm6, %v604_v63, %v606_v14  ;;  %v799_v16 = vld [vmem:[#allocation2 + $0x198] sm:$0xff] }
  0xdb   : > { %619 = vst [vmem:[#allocation2 + $0x120] sm:$0xf] %v611_v15  ;;  %327 = vrot.lane.b32.xlu1 %v1333_v3, %s1219_s19  ;;  %845 = vmatpush1.msra.mxu0 %v799_v16 }
  0xdc   : > { %325 = vrot.lane.b32.xlu0 %v1324_v1, %s1219_s19 }
  0xdd   : > { %v627_v17 = vpop.permute.xlu1 %626  ;;  %v625_v18 = vpop.permute.xlu0 %624 }
  0xde   : > { %v632_v19 = vsel %vm630_vm7, %v623_v13, %v625_v18  ;;  %v633_v20 = vsel %vm630_vm7, %v625_v18, %v627_v17 }
  0xdf   : > { %640 = vst [vmem:[#allocation2 + $0x18] sm:$0xf0] %v632_v19  ;;  %641 = vst [vmem:[#allocation2 + $0x158] sm:$0xf0] %v633_v20  ;;  %346 = vrot.lane.b32.xlu1 %v1326_v2, %s1220_s22 }
  0xe0   : > { %329 = vrot.lane.b32.xlu0 %v1322_v0, %s1219_s19 }
  0xe1   : > { %v598_v21 = vpop.permute.xlu1 %597  ;;  %v629_v22 = vpop.permute.xlu0 %628 }
  0xe2   : > { %v608_v23 = vsel %vm607_vm6, %v598_v21, %v600_v59  ;;  %v634_v24 = vsel %vm630_vm7, %v627_v17, %v629_v22  ;;  %vm239_vm6 = vcmask 1031168  }
  0xe3   : > { %616 = vst [vmem:[#allocation2 + $0x60] sm:$0xf] %v608_v23  ;;  %642 = vst [vmem:[#allocation2 + $0x120] sm:$0xf0] %v634_v24  ;;  %350 = vrot.lane.b32.xlu1 %v1324_v1, %s1220_s22  ;;  %v1226_v24 = vmov 0.0  }
  0xe4   : > { %348 = vrot.lane.b32.xlu0 %v1352_v5, %s1220_s22  ;;  %898 = vmatprep.mubr.f32.mxu0 %v1226_v24 }
  0xe5   : > { %v554_v25 = vpop.permute.xlu1 %553  ;;  %v621_v26 = vpop.permute.xlu0 %620  ;;  %969 = vmatprep.mubr.f32.mxu1 %v1226_v24 }
  0xe6   : > { %v631_v27 = vsel %vm630_vm7, %v621_v26, %v623_v13  ;;  %v796_v28 = vld [vmem:[#allocation2 + $0x18] sm:$0xff]  ;;  %vm262_vm7 = vcmask 1022976  }
  0xe7   : > { %639 = vst [vmem:[#allocation2 + $0x60] sm:$0xf0] %v631_v27  ;;  %321 = vrot.lane.b32.xlu1 %v1326_v2, %s1219_s19  ;;  %846 = vmatprep.subr.mxu0 %v796_v28  ;;  %v797_v34 = vld [vmem:[#allocation2 + $0x158] sm:$0xff]  ;;  %v1227_v28 = vmov 0  }
  0xe8   : > { %352 = vrot.lane.b32.xlu0 %v1358_v6, %s1220_s22 }
  0xe9   : > { %v558_v29 = vpop.permute.xlu1 %557  ;;  %v556_v30 = vpop.permute.xlu0 %555  ;;  %1131 = vset.pattern.permute.xlu0 %v1227_v28 }
  0xea   : > { %v563_v31 = vsel %vm561_vm8, %v554_v25, %v556_v30  ;;  %v564_v32 = vsel %vm561_vm8, %v556_v30, %v558_v29  ;;  %v798_v33 = vld [vmem:[#allocation2 + $0x120] sm:$0xff] }
  0xeb   : > { %571 = vst [vmem:[#allocation2 + $0x168] sm:$0xf] %v563_v31  ;;  %572 = vst [vmem:[#allocation2 + $0x190] sm:$0xf] %v564_v32  ;;  %277 = vrot.lane.b32.xlu1 %v1338_v4, %s1221_s23  ;;  %917 = vmatprep.subr.mxu1 %v798_v33 }
  0xec   : > { %344 = vrot.lane.b32.xlu0 %v1364_v7, %s1220_s22  ;;  %918 = vmatpush1.msra.mxu1 %v797_v34 }
  0xed   : > { %v577_v35 = vpop.permute.xlu1 %576  ;;  %v560_v36 = vpop.permute.xlu0 %559 }
  0xee   : > { %v565_v37 = vsel %vm561_vm8, %v558_v29, %v560_v36  ;;  %v795_v38 = vld [vmem:[#allocation2 + $0x60] sm:$0xff] }
  0xef   : > { %573 = vst [vmem:[#allocation2 + $0x38] sm:$0xf] %v565_v37  ;;  %281 = vrot.lane.b32.xlu1 %v1333_v3, %s1221_s23  ;;  %847 = vmatpush1.msra.mxu0 %v795_v38 }
  0xf0   : > { %279 = vrot.lane.b32.xlu0 %v1324_v1, %s1221_s23 }
  0xf1   : > { %v581_v39 = vpop.permute.xlu1 %580  ;;  %v579_v40 = vpop.permute.xlu0 %578 }
  0xf2   : > { %v586_v41 = vsel %vm584_vm9, %v577_v35, %v579_v40  ;;  %v587_v42 = vsel %vm584_vm9, %v579_v40, %v581_v39 }
  0xf3   : > { %594 = vst [vmem:[#allocation2 + $0x168] sm:$0xf0] %v586_v41  ;;  %595 = vst [vmem:[#allocation2 + $0x190] sm:$0xf0] %v587_v42  ;;  %300 = vrot.lane.b32.xlu1 %v1326_v2, %s1222_s24 }
  0xf4   : > { %283 = vrot.lane.b32.xlu0 %v1322_v0, %s1221_s23 }
  0xf5   : > { %v552_v43 = vpop.permute.xlu1 %551  ;;  %v583_v44 = vpop.permute.xlu0 %582 }
  0xf6   : > { %v562_v45 = vsel %vm561_vm8, %v552_v43, %v554_v25  ;;  %v588_v46 = vsel %vm584_vm9, %v581_v39, %v583_v44  ;;  %vm216_vm8 = vcmask 1039360  }
  0xf7   : > { %570 = vst [vmem:[#allocation2 + $0x50] sm:$0xf] %v562_v45  ;;  %596 = vst [vmem:[#allocation2 + $0x38] sm:$0xf0] %v588_v46  ;;  %304 = vrot.lane.b32.xlu1 %v1324_v1, %s1222_s24 }
  0xf8   : > { %302 = vrot.lane.b32.xlu0 %v1352_v5, %s1222_s24 }
  0xf9   : > { %v508_v47 = vpop.permute.xlu1 %507  ;;  %v575_v48 = vpop.permute.xlu0 %574 }
  0xfa   : > { %v585_v49 = vsel %vm584_vm9, %v575_v48, %v577_v35  ;;  %v792_v50 = vld [vmem:[#allocation2 + $0x168] sm:$0xff]  ;;  %v793_v56 = vld [vmem:[#allocation2 + $0x190] sm:$0xff]  ;;  %vm817_vm9 = vcmask 818176  }
  0xfb   : > { %593 = vst [vmem:[#allocation2 + $0x50] sm:$0xf0] %v585_v49  ;;  %275 = vrot.lane.b32.xlu1 %v1326_v2, %s1221_s23  ;;  %848 = vmatprep.subr.mxu0 %v792_v50 }
  0xfc   : > { %306 = vrot.lane.b32.xlu0 %v1358_v6, %s1222_s24 }
  0xfd   : > { %v512_v51 = vpop.permute.xlu1 %511  ;;  %v510_v52 = vpop.permute.xlu0 %509 }
  0xfe   : > { %v517_v53 = vsel %vm515_vm10, %v508_v47, %v510_v52  ;;  %v518_v54 = vsel %vm515_vm10, %v510_v52, %v512_v51  ;;  %v794_v55 = vld [vmem:[#allocation2 + $0x38] sm:$0xff] }
  0xff   : > { %525 = vst [vmem:[#allocation2 + $0x170] sm:$0xf] %v517_v53  ;;  %526 = vst [vmem:[#allocation2 + $0xc0] sm:$0xf] %v518_v54  ;;  %231 = vrot.lane.b32.xlu1 %v1338_v4, %s1223_s26  ;;  %919 = vmatprep.subr.mxu1 %v794_v55 }
 0x100   : > { %298 = vrot.lane.b32.xlu0 %v1364_v7, %s1222_s24  ;;  %920 = vmatpush1.msra.mxu1 %v793_v56 }
 0x101   : > { %v531_v57 = vpop.permute.xlu1 %530  ;;  %v514_v58 = vpop.permute.xlu0 %513 }
 0x102   : > { %v519_v59 = vsel %vm515_vm10, %v512_v51, %v514_v58  ;;  %v791_v60 = vld [vmem:[#allocation2 + $0x50] sm:$0xff] }
 0x103   : > { %527 = vst [vmem:[#allocation2 + $0x140] sm:$0xf] %v519_v59  ;;  %235 = vrot.lane.b32.xlu1 %v1333_v3, %s1223_s26  ;;  %849 = vmatpush1.msra.mxu0 %v791_v60 }
 0x104   : > { %233 = vrot.lane.b32.xlu0 %v1324_v1, %s1223_s26 }
 0x105   : > { %v535_v4 = vpop.permute.xlu1 %534  ;;  %v533_v61 = vpop.permute.xlu0 %532 }
 0x106   : > { %v540_v62 = vsel %vm538_vm11, %v531_v57, %v533_v61  ;;  %v541_v63 = vsel %vm538_vm11, %v533_v61, %v535_v4 }
 0x107   : > { %548 = vst [vmem:[#allocation2 + $0x170] sm:$0xf0] %v540_v62  ;;  %549 = vst [vmem:[#allocation2 + $0xc0] sm:$0xf0] %v541_v63  ;;  %254 = vrot.lane.b32.xlu1 %v1326_v2, %s1224_s15 }
 0x108   : > { %237 = vrot.lane.b32.xlu0 %v1322_v0, %s1223_s26 }
 0x109   : > { %v506_v3 = vpop.permute.xlu1 %505  ;;  %v537_v8 = vpop.permute.xlu0 %536 }
 0x10a   : > { %v516_v9 = vsel %vm515_vm10, %v506_v3, %v508_v47  ;;  %v542_v10 = vsel %vm538_vm11, %v535_v4, %v537_v8 }
 0x10b   : > { %524 = vst [vmem:[#allocation2 + $0xb8] sm:$0xf] %v516_v9  ;;  %550 = vst [vmem:[#allocation2 + $0x140] sm:$0xf0] %v542_v10  ;;  %258 = vrot.lane.b32.xlu1 %v1324_v1, %s1224_s15 }
 0x10c   : > { %256 = vrot.lane.b32.xlu0 %v1352_v5, %s1224_s15 }
 0x10d   : > { %v462_v11 = vpop.permute.xlu1 %461  ;;  %v529_v12 = vpop.permute.xlu0 %528 }
 0x10e   : > { %v539_v13 = vsel %vm538_vm11, %v529_v12, %v531_v57  ;;  %v788_v14 = vld [vmem:[#allocation2 + $0x170] sm:$0xff]  ;;  %v789_v19 = vld [vmem:[#allocation2 + $0xc0] sm:$0xff] }
 0x10f   : > { %547 = vst [vmem:[#allocation2 + $0xb8] sm:$0xf0] %v539_v13  ;;  %229 = vrot.lane.b32.xlu1 %v1326_v2, %s1223_s26  ;;  %850 = vmatprep.subr.mxu0 %v788_v14 }
 0x110   : > { %260 = vrot.lane.b32.xlu0 %v1358_v6, %s1224_s15 }
 0x111   : > { %v466_v0 = vpop.permute.xlu1 %465  ;;  %v464_v15 = vpop.permute.xlu0 %463 }
 0x112   : > { %v471_v16 = vsel %vm469_vm12, %v462_v11, %v464_v15  ;;  %v472_v17 = vsel %vm469_vm12, %v464_v15, %v466_v0  ;;  %v790_v18 = vld [vmem:[#allocation2 + $0x140] sm:$0xff] }
 0x113   : > { %479 = vst [vmem:[#allocation2 + $0x188] sm:$0xf] %v471_v16  ;;  %480 = vst [vmem:[#allocation2 + $0xa8] sm:$0xf] %v472_v17  ;;  %208 = vrot.lane.b32.xlu1 %v1326_v2, %s1225_s21  ;;  %921 = vmatprep.subr.mxu1 %v790_v18 }
 0x114   : > { %252 = vrot.lane.b32.xlu0 %v1364_v7, %s1224_s15  ;;  %922 = vmatpush1.msra.mxu1 %v789_v19 }
 0x115   : > { %v485_v20 = vpop.permute.xlu1 %484  ;;  %v468_v21 = vpop.permute.xlu0 %467 }
 0x116   : > { %v473_v22 = vsel %vm469_vm12, %v466_v0, %v468_v21  ;;  %v787_v23 = vld [vmem:[#allocation2 + $0xb8] sm:$0xff] }
 0x117   : > { %481 = vst [vmem:[#allocation2 + $0x88] sm:$0xf] %v473_v22  ;;  %212 = vrot.lane.b32.xlu1 %v1324_v1, %s1225_s21  ;;  %851 = vmatpush1.msra.mxu0 %v787_v23 }
 0x118   : > { %210 = vrot.lane.b32.xlu0 %v1352_v5, %s1225_s21  ;;  %v811_v5 = vld [vmem:[%s1625_s2] sm:$0x3f] }
 0x119   : > { %v489_v2 = vpop.permute.xlu1 %488  ;;  %v487_v25 = vpop.permute.xlu0 %486 }
 0x11a   : > { %v494_v26 = vsel %vm492_vm13, %v485_v20, %v487_v25  ;;  %v495_v27 = vsel %vm492_vm13, %v487_v25, %v489_v2 }
 0x11b   : > { %502 = vst [vmem:[#allocation2 + $0x188] sm:$0xf0] %v494_v26  ;;  %503 = vst [vmem:[#allocation2 + $0xa8] sm:$0xf0] %v495_v27  ;;  %206 = vrot.lane.b32.xlu1 %v1364_v7, %s1225_s21 }
 0x11c   : > { %214 = vrot.lane.b32.xlu0 %v1358_v6, %s1225_s21 }
 0x11d   : > { %v460_v1 = vpop.permute.xlu1 %459  ;;  %v491_v29 = vpop.permute.xlu0 %490 }
 0x11e   : > { %v470_v30 = vsel %vm469_vm12, %v460_v1, %v462_v11  ;;  %v496_v31 = vsel %vm492_vm13, %v489_v2, %v491_v29 }
 0x11f   : > { %478 = vst [vmem:[#allocation2 + $0xf0] sm:$0xf] %v470_v30  ;;  %504 = vst [vmem:[#allocation2 + $0x88] sm:$0xf0] %v496_v31 }
 0x120   : > { %814 = vperm.xlu0 %1131, %v811_v5  }
 0x121   : > { %v416_v32 = vpop.permute.xlu1 %415 }
 0x122   : > { %v483_v33 = vpop.permute.xlu0 %482  ;;  %v784_v7 = vld [vmem:[#allocation2 + $0x188] sm:$0xff] }
 0x123   : > { %v493_v34 = vsel %vm492_vm13, %v483_v33, %v485_v20  ;;  %852 = vmatprep.subr.mxu0 %v784_v7  ;;  %v785_v39 = vld [vmem:[#allocation2 + $0xa8] sm:$0xff] }
 0x124   : > { %501 = vst [vmem:[#allocation2 + $0xf0] sm:$0xf0] %v493_v34 }
 0x125   : > { %v420_v6 = vpop.permute.xlu1 %419 }
 0x126   : > { %v418_v35 = vpop.permute.xlu0 %417  ;;  %v786_v36 = vld [vmem:[#allocation2 + $0x88] sm:$0xff] }
 0x127   : > { %v425_v37 = vsel %vm423_vm14, %v416_v32, %v418_v35  ;;  %v426_v38 = vsel %vm423_vm14, %v418_v35, %v420_v6  ;;  %923 = vmatprep.subr.mxu1 %v786_v36 }
 0x128   : > { %433 = vst [vmem:[#allocation2] sm:$0xf] %v425_v37  ;;  %434 = vst [vmem:[#allocation2 + $0x20] sm:$0xf] %v426_v38  ;;  %924 = vmatpush1.msra.mxu1 %v785_v39 }
 0x129   : > { %v439_v40 = vpop.permute.xlu1 %438 }
 0x12a   : > { %v422_v41 = vpop.permute.xlu0 %421 }
 0x12b   : > { %v427_v42 = vsel %vm423_vm14, %v420_v6, %v422_v41  ;;  %v783_v43 = vld [vmem:[#allocation2 + $0xf0] sm:$0xff] }
 0x12c   : > { %435 = vst [vmem:[#allocation2 + $0xe0] sm:$0xf] %v427_v42  ;;  %853 = vmatpush1.msra.mxu0 %v783_v43 }
 0x12d   : > { %v443_v44 = vpop.permute.xlu1 %442 }
 0x12e   : > { %v441_v45 = vpop.permute.xlu0 %440 }
 0x12f   : > { %v448_v46 = vsel %vm446_vm15, %v439_v40, %v441_v45  ;;  %v449_v47 = vsel %vm446_vm15, %v441_v45, %v443_v44 }
 0x130   : > { %456 = vst [vmem:[#allocation2] sm:$0xf0] %v448_v46  ;;  %457 = vst [vmem:[#allocation2 + $0x20] sm:$0xf0] %v449_v47 }
 0x131   : > { %v414_v48 = vpop.permute.xlu1 %413 }
 0x132   : > { %v424_v49 = vsel %vm423_vm14, %v414_v48, %v416_v32  ;;  %v445_v50 = vpop.permute.xlu0 %444 }
 0x133   : > { %432 = vst [vmem:[#allocation2 + $0xa0] sm:$0xf] %v424_v49  ;;  %v450_v51 = vsel %vm446_vm15, %v443_v44, %v445_v50 }
 0x134   : > { %458 = vst [vmem:[#allocation2 + $0xe0] sm:$0xf0] %v450_v51 }
 0x135   : > { %v370_v52 = vpop.permute.xlu1 %369 }
 0x136   : > { %v437_v53 = vpop.permute.xlu0 %436 }
 0x137   : > { %v447_v54 = vsel %vm446_vm15, %v437_v53, %v439_v40  ;;  %v780_v55 = vld [vmem:[#allocation2] sm:$0xff] }
 0x138   : > { %455 = vst [vmem:[#allocation2 + $0xa0] sm:$0xf0] %v447_v54  ;;  %854 = vmatprep.subr.mxu0 %v780_v55  ;;  %v781_v4 = vld [vmem:[#allocation2 + $0x20] sm:$0xff] }
 0x139   : > { %v374_v56 = vpop.permute.xlu1 %373 }
 0x13a   : > { %v372_v57 = vpop.permute.xlu0 %371 }
 0x13b   : > { %v379_v58 = vsel %vm377_vm0, %v370_v52, %v372_v57  ;;  %v380_v59 = vsel %vm377_vm0, %v372_v57, %v374_v56  ;;  %v782_v60 = vld [vmem:[#allocation2 + $0xe0] sm:$0xff] }
 0x13c   : > { %387 = vst [vmem:[#allocation2 + $0x130] sm:$0xf] %v379_v58  ;;  %388 = vst [vmem:[#allocation2 + $0x138] sm:$0xf] %v380_v59  ;;  %925 = vmatprep.subr.mxu1 %v782_v60 }
 0x13d   : > { %926 = vmatpush1.msra.mxu1 %v781_v4  ;;  %v393_v61 = vpop.permute.xlu1 %392 }
 0x13e   : > { %v376_v62 = vpop.permute.xlu0 %375 }
 0x13f   : > { %v381_v63 = vsel %vm377_vm0, %v374_v56, %v376_v62  ;;  %v779_v3 = vld [vmem:[#allocation2 + $0xa0] sm:$0xff] }
 0x140   : > { %389 = vst [vmem:[#allocation2 + $0x78] sm:$0xf] %v381_v63  ;;  %855 = vmatpush1.msra.mxu0 %v779_v3 }
 0x141   : > { %v397_v8 = vpop.permute.xlu1 %396 }
 0x142   : > { %v395_v9 = vpop.permute.xlu0 %394 }
 0x143   : > { %v402_v10 = vsel %vm400_vm1, %v393_v61, %v395_v9  ;;  %v403_v11 = vsel %vm400_vm1, %v395_v9, %v397_v8 }
 0x144   : > { %410 = vst [vmem:[#allocation2 + $0x130] sm:$0xf0] %v402_v10  ;;  %411 = vst [vmem:[#allocation2 + $0x138] sm:$0xf0] %v403_v11 }
 0x145   : > { %v368_v12 = vpop.permute.xlu1 %367 }
 0x146   : > { %v378_v13 = vsel %vm377_vm0, %v368_v12, %v370_v52  ;;  %v399_v14 = vpop.permute.xlu0 %398 }
 0x147   : > { %386 = vst [vmem:[#allocation2 + $0x180] sm:$0xf] %v378_v13  ;;  %v404_v0 = vsel %vm400_vm1, %v397_v8, %v399_v14 }
 0x148   : > { %412 = vst [vmem:[#allocation2 + $0x78] sm:$0xf0] %v404_v0 }
 0x149   : > { %v324_v15 = vpop.permute.xlu1 %323 }
 0x14a   : > { %v391_v16 = vpop.permute.xlu0 %390 }
 0x14b   : > { %v401_v17 = vsel %vm400_vm1, %v391_v16, %v393_v61  ;;  %v776_v18 = vld [vmem:[#allocation2 + $0x130] sm:$0xff]  ;;  %v777_v24 = vld [vmem:[#allocation2 + $0x138] sm:$0xff] }
 0x14c   : > { %409 = vst [vmem:[#allocation2 + $0x180] sm:$0xf0] %v401_v17  ;;  %856 = vmatprep.subr.mxu0 %v776_v18 }
 0x14d   : > { %v328_v19 = vpop.permute.xlu1 %327 }
 0x14e   : > { %v326_v20 = vpop.permute.xlu0 %325 }
 0x14f   : > { %v333_v21 = vsel %vm331_vm2, %v324_v15, %v326_v20  ;;  %v334_v22 = vsel %vm331_vm2, %v326_v20, %v328_v19  ;;  %v778_v23 = vld [vmem:[#allocation2 + $0x78] sm:$0xff] }
 0x150   : > { %341 = vst [vmem:[#allocation2 + $0x100] sm:$0xf] %v333_v21  ;;  %342 = vst [vmem:[#allocation2 + $0x58] sm:$0xf] %v334_v22  ;;  %927 = vmatprep.subr.mxu1 %v778_v23 }
 0x151   : > { %928 = vmatpush1.msra.mxu1 %v777_v24  ;;  %v347_v2 = vpop.permute.xlu1 %346 }
 0x152   : > { %v330_v25 = vpop.permute.xlu0 %329 }
 0x153   : > { %v335_v26 = vsel %vm331_vm2, %v328_v19, %v330_v25  ;;  %v775_v27 = vld [vmem:[#allocation2 + $0x180] sm:$0xff] }
 0x154   : > { %343 = vst [vmem:[#allocation2 + $0xd8] sm:$0xf] %v335_v26  ;;  %857 = vmatpush1.msra.mxu0 %v775_v27 }
 0x155   : > { %v351_v28 = vpop.permute.xlu1 %350 }
 0x156   : > { %v349_v1 = vpop.permute.xlu0 %348 }
 0x157   : > { %v356_v29 = vsel %vm354_vm3, %v347_v2, %v349_v1  ;;  %v357_v5 = vsel %vm354_vm3, %v349_v1, %v351_v28 }
 0x158   : > { %364 = vst [vmem:[#allocation2 + $0x100] sm:$0xf0] %v356_v29  ;;  %365 = vst [vmem:[#allocation2 + $0x58] sm:$0xf0] %v357_v5 }
 0x159   : > { %v322_v30 = vpop.permute.xlu1 %321 }
 0x15a   : > { %v332_v31 = vsel %vm331_vm2, %v322_v30, %v324_v15  ;;  %v353_v32 = vpop.permute.xlu0 %352  ;;  %v758_v30 = vld [vmem:[%s1624_s1] sm:$0x3f] }
 0x15b   : > { %340 = vst [vmem:[#allocation2 + $0x148] sm:$0xf] %v332_v31  ;;  %v358_v33 = vsel %vm354_vm3, %v351_v28, %v353_v32 }
 0x15c   : > { %366 = vst [vmem:[#allocation2 + $0xd8] sm:$0xf0] %v358_v33 }
 0x15d   : > { %v278_v7 = vpop.permute.xlu1 %277 }
 0x15e   : > { %v345_v34 = vpop.permute.xlu0 %344 }
 0x15f   : > { %v355_v6 = vsel %vm354_vm3, %v345_v34, %v347_v2  ;;  %v772_v35 = vld [vmem:[#allocation2 + $0x100] sm:$0xff]  ;;  %v773_v41 = vld [vmem:[#allocation2 + $0x58] sm:$0xff] }
 0x160   : > { %363 = vst [vmem:[#allocation2 + $0x148] sm:$0xf0] %v355_v6  ;;  %858 = vmatprep.subr.mxu0 %v772_v35 }
 0x161   : > { %v282_v36 = vpop.permute.xlu1 %281 }
 0x162   : > { %v280_v37 = vpop.permute.xlu0 %279 }
 0x163   : > { %v287_v38 = vsel %vm285_vm4, %v278_v7, %v280_v37  ;;  %v288_v39 = vsel %vm285_vm4, %v280_v37, %v282_v36  ;;  %v774_v40 = vld [vmem:[#allocation2 + $0xd8] sm:$0xff] }
 0x164   : > { %295 = vst [vmem:[#allocation2 + $0x110] sm:$0xf] %v287_v38  ;;  %296 = vst [vmem:[#allocation2 + $0x90] sm:$0xf] %v288_v39  ;;  %929 = vmatprep.subr.mxu1 %v774_v40 }
 0x165   : > { %930 = vmatpush1.msra.mxu1 %v773_v41  ;;  %v301_v42 = vpop.permute.xlu1 %300 }
 0x166   : > { %v284_v43 = vpop.permute.xlu0 %283 }
 0x167   : > { %v289_v44 = vsel %vm285_vm4, %v282_v36, %v284_v43  ;;  %v771_v45 = vld [vmem:[#allocation2 + $0x148] sm:$0xff] }
 0x168   : > { %297 = vst [vmem:[#allocation2 + $0x118] sm:$0xf] %v289_v44  ;;  %859 = vmatpush1.msra.mxu0 %v771_v45 }
 0x169   : > { %v305_v46 = vpop.permute.xlu1 %304 }
 0x16a   : > { %v303_v47 = vpop.permute.xlu0 %302 }
 0x16b   : > { %v310_v48 = vsel %vm308_vm5, %v301_v42, %v303_v47  ;;  %v311_v49 = vsel %vm308_vm5, %v303_v47, %v305_v46 }
 0x16c   : > { %318 = vst [vmem:[#allocation2 + $0x110] sm:$0xf0] %v310_v48  ;;  %319 = vst [vmem:[#allocation2 + $0x90] sm:$0xf0] %v311_v49 }
 0x16d   : > { %v276_v50 = vpop.permute.xlu1 %275 }
 0x16e   : > { %v286_v51 = vsel %vm285_vm4, %v276_v50, %v278_v7  ;;  %v307_v52 = vpop.permute.xlu0 %306 }
 0x16f   : > { %294 = vst [vmem:[#allocation2 + $0x108] sm:$0xf] %v286_v51  ;;  %v312_v53 = vsel %vm308_vm5, %v305_v46, %v307_v52 }
 0x170   : > { %320 = vst [vmem:[#allocation2 + $0x118] sm:$0xf0] %v312_v53 }
 0x171   : > { %v232_v54 = vpop.permute.xlu1 %231 }
 0x172   : > { %v299_v55 = vpop.permute.xlu0 %298 }
 0x173   : > { %v309_v56 = vsel %vm308_vm5, %v299_v55, %v301_v42  ;;  %v768_v57 = vld [vmem:[#allocation2 + $0x110] sm:$0xff] }
 0x174   : > { %317 = vst [vmem:[#allocation2 + $0x108] sm:$0xf0] %v309_v56  ;;  %860 = vmatprep.subr.mxu0 %v768_v57  ;;  %v769_v62 = vld [vmem:[#allocation2 + $0x90] sm:$0xff] }
 0x175   : > { %v236_v58 = vpop.permute.xlu1 %235 }
 0x176   : > { %v234_v59 = vpop.permute.xlu0 %233 }
 0x177   : > { %v241_v60 = vsel %vm239_vm6, %v232_v54, %v234_v59  ;;  %v242_v4 = vsel %vm239_vm6, %v234_v59, %v236_v58  ;;  %v770_v61 = vld [vmem:[#allocation2 + $0x118] sm:$0xff] }
 0x178   : > { %249 = vst [vmem:[#allocation2 + $0x128] sm:$0xf] %v241_v60  ;;  %250 = vst [vmem:[#allocation2 + $0x40] sm:$0xf] %v242_v4  ;;  %931 = vmatprep.subr.mxu1 %v770_v61 }
 0x179   : > { %932 = vmatpush1.msra.mxu1 %v769_v62  ;;  %v255_v63 = vpop.permute.xlu1 %254 }
 0x17a   : > { %v238_v3 = vpop.permute.xlu0 %237 }
 0x17b   : > { %v243_v8 = vsel %vm239_vm6, %v236_v58, %v238_v3  ;;  %v767_v9 = vld [vmem:[#allocation2 + $0x108] sm:$0xff] }
 0x17c   : > { %251 = vst [vmem:[#allocation2 + $0x178] sm:$0xf] %v243_v8  ;;  %861 = vmatpush1.msra.mxu0 %v767_v9 }
 0x17d   : > { %v259_v10 = vpop.permute.xlu1 %258 }
 0x17e   : > { %v257_v11 = vpop.permute.xlu0 %256 }
 0x17f   : > { %v264_v12 = vsel %vm262_vm7, %v255_v63, %v257_v11  ;;  %v265_v13 = vsel %vm262_vm7, %v257_v11, %v259_v10 }
 0x180   : > { %272 = vst [vmem:[#allocation2 + $0x128] sm:$0xf0] %v264_v12  ;;  %273 = vst [vmem:[#allocation2 + $0x40] sm:$0xf0] %v265_v13 }
 0x181   : > { %v230_v14 = vpop.permute.xlu1 %229 }
 0x182   : > { %v240_v0 = vsel %vm239_vm6, %v230_v14, %v232_v54  ;;  %v261_v15 = vpop.permute.xlu0 %260 }
 0x183   : > { %248 = vst [vmem:[#allocation2 + $0x160] sm:$0xf] %v240_v0  ;;  %v266_v16 = vsel %vm262_vm7, %v259_v10, %v261_v15 }
 0x184   : > { %274 = vst [vmem:[#allocation2 + $0x178] sm:$0xf0] %v266_v16 }
 0x185   : > { %v209_v17 = vpop.permute.xlu1 %208 }
 0x186   : > { %v253_v18 = vpop.permute.xlu0 %252 }
 0x187   : > { %v263_v19 = vsel %vm262_vm7, %v253_v18, %v255_v63  ;;  %v764_v20 = vld [vmem:[#allocation2 + $0x128] sm:$0xff]  ;;  %v765_v25 = vld [vmem:[#allocation2 + $0x40] sm:$0xff] }
 0x188   : > { %271 = vst [vmem:[#allocation2 + $0x160] sm:$0xf0] %v263_v19  ;;  %862 = vmatprep.subr.mxu0 %v764_v20 }
 0x189   : > { %v213_v21 = vpop.permute.xlu1 %212 }
 0x18a   : > { %v211_v22 = vpop.permute.xlu0 %210 }
 0x18b   : > { %v218_v23 = vsel %vm216_vm8, %v209_v17, %v211_v22  ;;  %v219_v24 = vsel %vm216_vm8, %v211_v22, %v213_v21  ;;  %v766_v2 = vld [vmem:[#allocation2 + $0x178] sm:$0xff] }
 0x18c   : > { %226 = vst [vmem:[#allocation2 + $0xd0] sm:$0xf0] %v218_v23  ;;  %227 = vst [vmem:[#allocation2 + $0x10] sm:$0xf0] %v219_v24  ;;  %933 = vmatprep.subr.mxu1 %v766_v2 }
 0x18d   : > { %934 = vmatpush1.msra.mxu1 %v765_v25  ;;  %v207_v26 = vpop.permute.xlu1 %206 }
 0x18e   : > { %v217_v27 = vsel %vm216_vm8, %v207_v26, %v209_v17  ;;  %v215_v28 = vpop.permute.xlu0 %214 }
 0x18f   : > { %225 = vst [vmem:[#allocation2 + $0xb0] sm:$0xf0] %v217_v27  ;;  %v220_v1 = vsel %vm216_vm8, %v213_v21, %v215_v28  ;;  %v763_v29 = vld [vmem:[#allocation2 + $0x160] sm:$0xff] }
 0x190   : > { %228 = vst [vmem:[#allocation2 + $0x48] sm:$0xf0] %v220_v1  ;;  %863 = vmatpush1.msra.mxu0 %v763_v29 }
 0x193   : > { %v760_v5 = vld [vmem:[#allocation2 + $0xd0] sm:$0xff] }
 0x194   : > { %864 = vmatprep.subr.mxu0 %v760_v5  ;;  %v761_v33 = vld [vmem:[#allocation2 + $0x10] sm:$0xff] }
 0x196   : > { %v759_v31 = vld [vmem:[#allocation2 + $0xb0] sm:$0xff] }
 0x197   : > { %865 = vmatpush1.msra.mxu0 %v759_v31  ;;  %v762_v32 = vld [vmem:[#allocation2 + $0x48] sm:$0xff] }
 0x198   : > { %935 = vmatprep.subr.mxu1 %v762_v32  ;;  %1056 = vmatmul.mubr.msk.f32.vlgmr.msra.gmra.mxu0 %vm817_vm9, %v758_v30 }
 0x199   : > { %936 = vmatpush1.msra.mxu1 %v761_v33 }
 0x19a   : > { %1059 = vmatmul.mubr.msk.f32.vlgmr.msra.gmra.mxu1 %vm817_vm9, %v758_v30 }
 0x19b   : > { %v815_v7 = vpop.permute.xlu0 %814 }
 0x258   : > { %v900_v34 = vpop.f32.mrf.mxu0 }
 0x259   : > { %v901_v6 = vadd.f32 %v900_v34, %v815_v7 }
 0x25a   : > { %v971_v35 = vpop.f32.mrf.mxu1  ;;  %v902_v36 = vpop.f32.mrf.mxu0 }
 0x25b   : > { %v972_v37 = vadd.f32 %v971_v35, %v815_v7  ;;  %976 = vst [vmem:[%s188_s6] sm:$0x3f] %v901_v6  ;;  %v903_v38 = vadd.f32 %v902_v36, %v815_v7 }
 0x25c   : > { %v973_v39 = vpop.f32.mrf.mxu1 }
 0x25d   : > { %978 = vst [vmem:[%s188_s6 + $0x10] sm:$0x3f] %v972_v37  ;;  %977 = vst [vmem:[%s188_s6 + $0x8] sm:$0x3f] %v903_v38  ;;  %v974_v40 = vadd.f32 %v973_v39, %v815_v7 }
 0x25f   : > { %979 = vst [vmem:[%s188_s6 + $0x18] sm:$0x3f] %v974_v40 }
 0x260 PF: > { %p13_p8 = scmp.ge.s32.totalorder %s1270_s17, 4   ;;  %s1632_s12 = smov %s1191_s13 }
 0x261   : > { %s1633_s13 = smov %s1195_s14  ;;  %s1634_s14 = smov %s1280_s20 }
 0x262   : > { %s1635_s15 = smov %s1270_s17  ;;  %15 = sbr.rel (!%p13_p8) target bundleno = 3 (0x3), region = 72 }
 0x267   :  { %1001 = vsyncpa [#allocation4], 1 }
 0x268   :  { %1003 = vsyncpa [#allocation4 + $0x1], 1 }

</bundles_post_ra>
